<compile_context>
chip_gen: v5e
topology: v5e:2x2
jax: 0.10.0
libtpu: 0.0.40
codegen_flags: <defaults>
</compile_context>

<pallas_src>
import jax
import jax.numpy as jnp
from jax.experimental import pallas as pl
from jax.experimental.pallas import tpu as pltpu


def _channel_attention_kernel(x_ref, w1_ref, w2_ref, o_ref):
    # x_ref: (B, L, C) channels-last, w1_ref: (C, Cr), w2_ref: (Cr, C)
    x = x_ref[...]                                     # (B, L, C)
    B = x.shape[0]

    avg = jnp.mean(x, axis=1)                          # (B, C)  AdaptiveAvgPool1d(1)
    mx = jnp.max(x, axis=1)                            # (B, C)  AdaptiveMaxPool1d(1)

    def fc(v):                                         # shared 2-layer bottleneck FC
        h = jnp.maximum(
            jnp.dot(v, w1_ref[...], preferred_element_type=jnp.float32), 0.0)
        return jnp.dot(h, w2_ref[...], preferred_element_type=jnp.float32)

    att = jax.nn.sigmoid(fc(avg) + fc(mx))             # (B, C)
    o_ref[...] = x * att[:, None, :]                   # broadcast over L


def channel_attention(x_ncl, w1, w2):
    """PyTorch-layout entry point.

    x_ncl: (B, C, L) exactly as the PyTorch module receives it.
    w1:    (C, Cr)   == fc[0].weight.squeeze(-1).T
    w2:    (Cr, C)   == fc[2].weight.squeeze(-1).T
    Returns (B, C, L).
    """
    B, C, L = x_ncl.shape
    Cr = w1.shape[1]
    # Layout plumbing to put C on the lane axis; cheap XLA transpose outside the kernel.
    x = jnp.transpose(x_ncl, (0, 2, 1))                # (B, L, C)

    out = pl.pallas_call(
        _channel_attention_kernel,
        out_shape=jax.ShapeDtypeStruct((B, L, C), x.dtype),
        grid=(1,),
        in_specs=[
            pl.BlockSpec((B, L, C), lambda i: (0, 0, 0)),
            pl.BlockSpec((C, Cr), lambda i: (0, 0)),
            pl.BlockSpec((Cr, C), lambda i: (0, 0)),
        ],
        out_specs=pl.BlockSpec((B, L, C), lambda i: (0, 0, 0)),
        compiler_params=pltpu.CompilerParams(
            dimension_semantics=("arbitrary",)),
    )(x, w1, w2)

    return jnp.transpose(out, (0, 2, 1))               # back to (B, C, L)


def _channel_attention_ref(x_ncl, w1, w2):
    """Pure-JAX reference mirroring the PyTorch forward (for correctness check)."""
    avg = jnp.mean(x_ncl, axis=2)                      # (B, C)
    mx = jnp.max(x_ncl, axis=2)                        # (B, C)

    def fc(v):
        return jnp.maximum(v @ w1, 0.0) @ w2

    att = jax.nn.sigmoid(fc(avg) + fc(mx))             # (B, C)
    return x_ncl * att[:, :, None]


if __name__ == "__main__":
    B, C, L, reduction = 2, 256, 16, 16
    Cr = C // reduction

    key = jax.random.PRNGKey(0)
    kx, k1, k2 = jax.random.split(key, 3)
    x = jax.random.normal(kx, (B, C, L), jnp.float32)
    # Synthetic weights stored already transposed to (C, Cr) / (Cr, C).
    w1 = (0.05 * jax.random.normal(k1, (C, Cr))).astype(jnp.float32)
    w2 = (0.05 * jax.random.normal(k2, (Cr, C))).astype(jnp.float32)

    fwd = jax.jit(channel_attention)
    y = fwd(x, w1, w2)
    jax.block_until_ready(y)

    y_ref = _channel_attention_ref(x, w1, w2)

    assert y.shape == (B, C, L), y.shape
    assert bool(jnp.all(jnp.isfinite(y)))
    assert bool(jnp.allclose(y, y_ref, rtol=2e-3, atol=2e-3)), \
        float(jnp.max(jnp.abs(y - y_ref)))
    print("KERNEL_OK")
</pallas_src>

<mosaic_0001>
module attributes {stable_mosaic.version = 11 : i64} {
  func.func @_channel_attention_kernel(%arg0: i32, %arg1: memref<2x16x256xf32, #tpu.memory_space<vmem>>, %arg2: memref<256x16xf32, #tpu.memory_space<vmem>>, %arg3: memref<16x256xf32, #tpu.memory_space<vmem>>, %arg4: memref<2x16x256xf32, #tpu.memory_space<vmem>>) attributes {dimension_semantics = [#tpu.dimension_semantics<arbitrary>], iteration_bounds = array<i64: 1>, scalar_prefetch = 0 : i64, scratch_operands = 0 : i64, tpu.core_type = #tpu.core_type<tc>, window_params = [{pipeline_mode = #tpu.pipeline_mode<synchronous>, transform_indices = @transform_0, window_bounds = array<i64: 2, 16, 256>}, {pipeline_mode = #tpu.pipeline_mode<synchronous>, transform_indices = @transform_1, window_bounds = array<i64: 256, 16>}, {pipeline_mode = #tpu.pipeline_mode<synchronous>, transform_indices = @transform_2, window_bounds = array<i64: 16, 256>}, {pipeline_mode = #tpu.pipeline_mode<synchronous>, transform_indices = @transform_3, window_bounds = array<i64: 2, 16, 256>}]} {
    %c0 = arith.constant 0 : index
    %c0_0 = arith.constant 0 : index
    %c0_1 = arith.constant 0 : index
    %0 = vector.load %arg1[%c0, %c0_0, %c0_1] : memref<2x16x256xf32, #tpu.memory_space<vmem>>, vector<2x16x256xf32>
    %cst = arith.constant dense<0.000000e+00> : vector<2x256xf32>
    %1 = vector.multi_reduction <add>, %0, %cst [1] : vector<2x16x256xf32> to vector<2x256xf32>
    %cst_2 = arith.constant 1.600000e+01 : f32
    %2 = vector.broadcast %cst_2 : f32 to vector<2x256xf32>
    %3 = arith.divf %1, %2 : vector<2x256xf32>
    %cst_3 = arith.constant dense<0xFF800000> : vector<2x256xf32>
    %4 = vector.multi_reduction <maximumf>, %0, %cst_3 [1] : vector<2x16x256xf32> to vector<2x256xf32>
    %c0_4 = arith.constant 0 : index
    %c0_5 = arith.constant 0 : index
    %5 = vector.load %arg2[%c0_4, %c0_5] : memref<256x16xf32, #tpu.memory_space<vmem>>, vector<256x16xf32>
    %cst_6 = arith.constant dense<0.000000e+00> : vector<2x16xf32>
    %6 = tpu.matmul %3, %5, %cst_6 {dimension_numbers = #tpu.dot_dimension_numbers<[1], [0], [0], [1], [0, 0, 1, 1], [], []>} : vector<2x256xf32>, vector<256x16xf32>, vector<2x16xf32> -> vector<2x16xf32>
    %cst_7 = arith.constant 0.000000e+00 : f32
    %7 = vector.broadcast %cst_7 : f32 to vector<2x16xf32>
    %8 = arith.maximumf %6, %7 : vector<2x16xf32>
    %c0_8 = arith.constant 0 : index
    %c0_9 = arith.constant 0 : index
    %9 = vector.load %arg3[%c0_8, %c0_9] : memref<16x256xf32, #tpu.memory_space<vmem>>, vector<16x256xf32>
    %cst_10 = arith.constant dense<0.000000e+00> : vector<2x256xf32>
    %10 = tpu.matmul %8, %9, %cst_10 {dimension_numbers = #tpu.dot_dimension_numbers<[1], [0], [0], [1], [0, 0, 1, 1], [], []>} : vector<2x16xf32>, vector<16x256xf32>, vector<2x256xf32> -> vector<2x256xf32>
    %c0_11 = arith.constant 0 : index
    %c0_12 = arith.constant 0 : index
    %11 = vector.load %arg2[%c0_11, %c0_12] : memref<256x16xf32, #tpu.memory_space<vmem>>, vector<256x16xf32>
    %cst_13 = arith.constant dense<0.000000e+00> : vector<2x16xf32>
    %12 = tpu.matmul %4, %11, %cst_13 {dimension_numbers = #tpu.dot_dimension_numbers<[1], [0], [0], [1], [0, 0, 1, 1], [], []>} : vector<2x256xf32>, vector<256x16xf32>, vector<2x16xf32> -> vector<2x16xf32>
    %cst_14 = arith.constant 0.000000e+00 : f32
    %13 = vector.broadcast %cst_14 : f32 to vector<2x16xf32>
    %14 = arith.maximumf %12, %13 : vector<2x16xf32>
    %c0_15 = arith.constant 0 : index
    %c0_16 = arith.constant 0 : index
    %15 = vector.load %arg3[%c0_15, %c0_16] : memref<16x256xf32, #tpu.memory_space<vmem>>, vector<16x256xf32>
    %cst_17 = arith.constant dense<0.000000e+00> : vector<2x256xf32>
    %16 = tpu.matmul %14, %15, %cst_17 {dimension_numbers = #tpu.dot_dimension_numbers<[1], [0], [0], [1], [0, 0, 1, 1], [], []>} : vector<2x16xf32>, vector<16x256xf32>, vector<2x256xf32> -> vector<2x256xf32>
    %17 = arith.addf %10, %16 : vector<2x256xf32>
    %18 = arith.negf %17 : vector<2x256xf32>
    %19 = math.exp %18 : vector<2x256xf32>
    %cst_18 = arith.constant 1.000000e+00 : f32
    %20 = vector.broadcast %cst_18 : f32 to vector<2x256xf32>
    %21 = arith.addf %20, %19 : vector<2x256xf32>
    %22 = arith.divf %20, %21 : vector<2x256xf32>
    %23 = vector.shape_cast %22 : vector<2x256xf32> to vector<2x1x256xf32>
    %24 = vector.broadcast %23 : vector<2x1x256xf32> to vector<2x16x256xf32>
    %25 = arith.mulf %0, %24 : vector<2x16x256xf32>
    %c0_19 = arith.constant 0 : index
    %c0_20 = arith.constant 0 : index
    %c0_21 = arith.constant 0 : index
    %26 = vector.load %arg4[%c0_19, %c0_20, %c0_21] : memref<2x16x256xf32, #tpu.memory_space<vmem>>, vector<2x16x256xf32>
    tpu.vector_store %arg4[%c0_19, %c0_20, %c0_21], %25 {strides = array<i32>} : memref<2x16x256xf32, #tpu.memory_space<vmem>>, vector<2x16x256xf32>,
    return
  }
  func.func @transform_0(%arg0: i32) -> (i32, i32, i32) {
    %c0_i32 = arith.constant 0 : i32
    %c0_i32_0 = arith.constant 0 : i32
    %c0_i32_1 = arith.constant 0 : i32
    %c0_i32_2 = arith.constant 0 : i32
    return %c0_i32, %c0_i32_0, %c0_i32_1 : i32, i32, i32
  }
  func.func @transform_1(%arg0: i32) -> (i32, i32) {
    %c0_i32 = arith.constant 0 : i32
    %c0_i32_0 = arith.constant 0 : i32
    %c0_i32_1 = arith.constant 0 : i32
    return %c0_i32, %c0_i32_0 : i32, i32
  }
  func.func @transform_2(%arg0: i32) -> (i32, i32) {
    %c0_i32 = arith.constant 0 : i32
    %c0_i32_0 = arith.constant 0 : i32
    %c0_i32_1 = arith.constant 0 : i32
    return %c0_i32, %c0_i32_0 : i32, i32
  }
  func.func @transform_3(%arg0: i32) -> (i32, i32, i32) {
    %c0_i32 = arith.constant 0 : i32
    %c0_i32_0 = arith.constant 0 : i32
    %c0_i32_1 = arith.constant 0 : i32
    %c0_i32_2 = arith.constant 0 : i32
    return %c0_i32, %c0_i32_0, %c0_i32_1 : i32, i32, i32
  }
}

</mosaic_0001>

<bundles_post_ra>
// kernel: channel_attention.1
= control target key start
LH: loop header
LB: loop body
LE: loop exit
PB: predicated region body
PF: predicated region fallthrough
CT: control target
= control target key end

     0   :  { %v445_v4 = vmov 16.0   ;;  %s656_s0 = inlined_call_operand.vmem [shape: f32[2,16,256], index: 0, kind: input, shape index: {}]   ;;  %s657_s1 = inlined_call_operand.vmem [shape: f32[256,16], index: 1, kind: input, shape index: {}]   ;;  %s658_s2 = inlined_call_operand.vmem [shape: f32[16,256], index: 2, kind: input, shape index: {}]   ;;  %s659_s3 = inlined_call_operand.hbm [shape: f32[2,16,256], index: 3, kind: output, shape index: {}]  }
   0x1   :  { %v105_v0 = vld [vmem:[%s657_s1 + $0x78] sm:$0xff]  ;;  %v104_v2 = vld [vmem:[%s657_s1 + $0x70] sm:$0xff]  ;;  %409 = vrcp.f32 %v445_v4  ;;  %v103_v5 = vld [vmem:[%s657_s1 + $0x68] sm:$0xff] }
   0x2   :  { %v121_v1 = vld [vmem:[%s657_s1 + $0xf8] sm:$0xff]  ;;  %131 = vmatpush.msra.mxu0 %v105_v0  ;;  %v120_v3 = vld [vmem:[%s657_s1 + $0xf0] sm:$0xff]  ;;  %184 = vmatpush.msra.mxu2 %v105_v0  ;;  %v119_v6 = vld [vmem:[%s657_s1 + $0xe8] sm:$0xff] }
   0x3   :  { %151 = vmatpush.msra.mxu1 %v121_v1  ;;  %204 = vmatpush.msra.mxu3 %v121_v1  ;;  %v102_v7 = vld [vmem:[%s657_s1 + $0x60] sm:$0xff]  ;;  %v101_v9 = vld [vmem:[%s657_s1 + $0x58] sm:$0xff]  ;;  %v100_v12 = vld [vmem:[%s657_s1 + $0x50] sm:$0xff] }
   0x4   :  { %132 = vmatpush.msra.mxu0 %v104_v2  ;;  %185 = vmatpush.msra.mxu2 %v104_v2  ;;  %v118_v8 = vld [vmem:[%s657_s1 + $0xe0] sm:$0xff]  ;;  %v117_v10 = vld [vmem:[%s657_s1 + $0xd8] sm:$0xff]  ;;  %v116_v13 = vld [vmem:[%s657_s1 + $0xd0] sm:$0xff] }
   0x5   :  { %152 = vmatpush.msra.mxu1 %v120_v3  ;;  %205 = vmatpush.msra.mxu3 %v120_v3  ;;  %v99_v15 = vld [vmem:[%s657_s1 + $0x48] sm:$0xff]  ;;  %v98_v17 = vld [vmem:[%s657_s1 + $0x40] sm:$0xff]  ;;  %v525_v21 = vld [vmem:[%s656_s0 + $0x10] sm:$0xff] }
   0x6   :  { %133 = vmatpush.msra.mxu0 %v103_v5  ;;  %186 = vmatpush.msra.mxu2 %v103_v5  ;;  %v115_v16 = vld [vmem:[%s657_s1 + $0xc8] sm:$0xff]  ;;  %v114_v18 = vld [vmem:[%s657_s1 + $0xc0] sm:$0xff]  ;;  %v535_v23 = vld [vmem:[%s656_s0 + $0x30] sm:$0xff] }
   0x7   :  { %153 = vmatpush.msra.mxu1 %v119_v6  ;;  %206 = vmatpush.msra.mxu3 %v119_v6  ;;  %v410_v11 = vpop.eup %409  ;;  %v520_v19 = vld [vmem:[%s656_s0] sm:$0xff]  ;;  %v544_v27 = vld [vmem:[%s656_s0 + $0x8] sm:$0xff]  ;;  %v549_v28 = vld [vmem:[%s656_s0 + $0x18] sm:$0xff] }
   0x8   :  { %134 = vmatpush.msra.mxu0 %v102_v7  ;;  %187 = vmatpush.msra.mxu2 %v102_v7  ;;  %v52_v14 = vmul.f32 16.0, %v410_v11  ;;  %v530_v22 = vld [vmem:[%s656_s0 + $0x20] sm:$0xff]  ;;  %v23_v24 = vadd.f32 %v525_v21, %v520_v19  ;;  %v554_v29 = vld [vmem:[%s656_s0 + $0x28] sm:$0xff]  ;;  %vm56_vm0 = vweird.f32 %v410_v11  ;;  %v559_v30 = vld [vmem:[%s656_s0 + $0x38] sm:$0xff]  ;;  %v30_v31 = vadd.f32 %v549_v28, %v544_v27 }
   0x9   :  { %154 = vmatpush.msra.mxu1 %v118_v8  ;;  %207 = vmatpush.msra.mxu3 %v118_v8  ;;  %v37_v25 = vadd.f32 %v535_v23, %v530_v22  ;;  %v62_v32 = vmax.f32 %v520_v19, %v525_v21  ;;  %v76_v33 = vmax.f32 %v530_v22, %v535_v23  ;;  %v97_v34 = vld [vmem:[%s657_s1 + $0x38] sm:$0xff] }
   0xa   :  { %135 = vmatpush.msra.mxu0 %v101_v9  ;;  %188 = vmatpush.msra.mxu2 %v101_v9  ;;  %v53_v20 = vsub.f32 1.0, %v52_v14  ;;  %v113_v35 = vld [vmem:[%s657_s1 + $0xb8] sm:$0xff]  ;;  %v24_v36 = vrot.slane %v23_v24, 4  ;;  %v44_v39 = vadd.f32 %v559_v30, %v554_v29 }
   0xb   :  { %155 = vmatpush.msra.mxu1 %v117_v10  ;;  %208 = vmatpush.msra.mxu3 %v117_v10  ;;  %v38_v37 = vrot.slane %v37_v25, 4 }
   0xc   :  { %136 = vmatpush.msra.mxu0 %v100_v12  ;;  %189 = vmatpush.msra.mxu2 %v100_v12  ;;  %v54_v26 = vmul.f32 %v410_v11, %v53_v20 }
   0xd   :  { %156 = vmatpush.msra.mxu1 %v116_v13  ;;  %209 = vmatpush.msra.mxu3 %v116_v13 }
   0xe   :  { %137 = vmatpush.msra.mxu0 %v99_v15  ;;  %190 = vmatpush.msra.mxu2 %v99_v15  ;;  %v55_v38 = vadd.f32 %v410_v11, %v54_v26 }
   0xf   :  { %157 = vmatpush.msra.mxu1 %v115_v16  ;;  %210 = vmatpush.msra.mxu3 %v115_v16 }
  0x10   :  { %8 = vsyncpa [#allocation3], 0  ;;  %138 = vmatpush.msra.mxu0 %v98_v17  ;;  %v31_v40 = vrot.slane %v30_v31, 4  ;;  %v63_v41 = vrot.slane %v62_v32, 4  ;;  %v77_v42 = vrot.slane %v76_v33, 4  ;;  %v69_v43 = vmax.f32 %v544_v27, %v549_v28  ;;  %191 = vmatpush.msra.mxu2 %v98_v17  ;;  %v96_v44 = vld [vmem:[%s657_s1 + $0x30] sm:$0xff] }
  0x11   :  { %158 = vmatpush.msra.mxu1 %v114_v18  ;;  %211 = vmatpush.msra.mxu3 %v114_v18  ;;  %v112_v45 = vld [vmem:[%s657_s1 + $0xb0] sm:$0xff]  ;;  %v25_v46 = vadd.f32 %v24_v36, %v23_v24  ;;  %v39_v47 = vadd.f32 %v38_v37, %v37_v25  ;;  %v584_v48 = vsel %vm56_vm0, %v410_v11, %v55_v38  ;;  %v45_v49 = vrot.slane %v44_v39, 4  ;;  %v95_v54 = vld [vmem:[%s657_s1 + $0x28] sm:$0xff]  ;;  %v94_v0 = vld [vmem:[%s657_s1 + $0x20] sm:$0xff]  ;;  %s387_s19 = sshll.u32 %s659_s3, 4  ;;  %s447_s20 = smov 256   ;;  %s388_s19 = int_to_ptr.hbm [resolvable:$true] %s387_s19 }
  0x12   :  { %139 = vmatpush.msra.mxu0 %v97_v34  ;;  %v32_v50 = vadd.f32 %v31_v40, %v30_v31  ;;  %v64_v51 = vmax.f32 %v62_v32, %v63_v41  ;;  %v78_v52 = vmax.f32 %v76_v33, %v77_v42  ;;  %v70_v53 = vrot.slane %v69_v43, 4  ;;  %192 = vmatpush.msra.mxu2 %v97_v34  ;;  %v111_v55 = vld [vmem:[%s657_s1 + $0xa8] sm:$0xff]  ;;  %v110_v1 = vld [vmem:[%s657_s1 + $0xa0] sm:$0xff]  ;;  %v93_v10 = vld [vmem:[%s657_s1 + $0x18] sm:$0xff]  ;;  %s448_s21 = smov 16  }
  0x13   :  { %159 = vmatpush.msra.mxu1 %v113_v35  ;;  %212 = vmatpush.msra.mxu3 %v113_v35  ;;  %v26_v56 = vrot.slane %v25_v46, 2  ;;  %v40_v57 = vrot.slane %v39_v47, 2  ;;  %v46_v58 = vadd.f32 %v45_v49, %v44_v39  ;;  %v83_v59 = vmax.f32 %v554_v29, %v559_v30  ;;  %v109_v11 = vld [vmem:[%s657_s1 + $0x98] sm:$0xff]  ;;  %v92_v24 = vld [vmem:[%s657_s1 + $0x10] sm:$0xff]  ;;  %v91_v35 = vld [vmem:[%s657_s1 + $0x8] sm:$0xff] }
  0x14   :  { %140 = vmatpush.msra.mxu0 %v96_v44  ;;  %v33_v60 = vrot.slane %v32_v50, 2  ;;  %v65_v61 = vrot.slane %v64_v51, 2  ;;  %v79_v62 = vrot.slane %v78_v52, 2  ;;  %v71_v63 = vmax.f32 %v69_v43, %v70_v53  ;;  %193 = vmatpush.msra.mxu2 %v96_v44  ;;  %v108_v25 = vld [vmem:[%s657_s1 + $0x90] sm:$0xff]  ;;  %v107_v36 = vld [vmem:[%s657_s1 + $0x88] sm:$0xff]  ;;  %v90_v44 = vld [vmem:[%s657_s1] sm:$0xff] }
  0x15   :  { %160 = vmatpush.msra.mxu1 %v112_v45  ;;  %213 = vmatpush.msra.mxu3 %v112_v45  ;;  %v27_v2 = vadd.f32 %v26_v56, %v25_v46  ;;  %v41_v3 = vadd.f32 %v40_v57, %v39_v47  ;;  %v47_v4 = vrot.slane %v46_v58, 2  ;;  %v84_v5 = vrot.slane %v83_v59, 4  ;;  %v106_v45 = vld [vmem:[%s657_s1 + $0x80] sm:$0xff]  ;;  %v173_v57 = vld [vmem:[%s658_s2 + $0x8] sm:$0xff] }
  0x16   :  { %141 = vmatpush.msra.mxu0 %v95_v54  ;;  %v34_v6 = vadd.f32 %v33_v60, %v32_v50  ;;  %v66_v7 = vmax.f32 %v64_v51, %v65_v61  ;;  %v80_v8 = vmax.f32 %v78_v52, %v79_v62  ;;  %v72_v9 = vrot.slane %v71_v63, 2  ;;  %194 = vmatpush.msra.mxu2 %v95_v54  ;;  %v175_v54 = vld [vmem:[%s658_s2 + $0x18] sm:$0xff] }
  0x17   :  { %161 = vmatpush.msra.mxu1 %v111_v55  ;;  %214 = vmatpush.msra.mxu3 %v111_v55  ;;  %v28_v12 = vrot.slane %v27_v2, 1  ;;  %v42_v13 = vrot.slane %v41_v3, 1  ;;  %v48_v14 = vadd.f32 %v47_v4, %v46_v58  ;;  %v85_v15 = vmax.f32 %v83_v59, %v84_v5  ;;  %v174_v55 = vld [vmem:[%s658_s2 + $0x10] sm:$0xff]  ;;  %v172_v58 = vld [vmem:[%s658_s2] sm:$0xff]  ;;  %s446_s2 = smov [#allocation2]  }
  0x18   :  { %142 = vmatpush.msra.mxu0 %v94_v0  ;;  %v35_v16 = vrot.slane %v34_v6, 1  ;;  %v67_v17 = vrot.slane %v66_v7, 1  ;;  %v81_v18 = vrot.slane %v80_v8, 1  ;;  %v73_v20 = vmax.f32 %v71_v63, %v72_v9  ;;  %195 = vmatpush.msra.mxu2 %v94_v0  ;;  %s385_s16 = sshll.u32 %s446_s2, 4  ;;  %s386_s16 = int_to_ptr.vmem [resolvable:$true] %s385_s16 }
  0x19   :  { %162 = vmatpush.msra.mxu1 %v110_v1  ;;  %215 = vmatpush.msra.mxu3 %v110_v1  ;;  %v29_v26 = vadd.f32 %v28_v12, %v27_v2  ;;  %v43_v31 = vadd.f32 %v42_v13, %v41_v3  ;;  %v49_v32 = vrot.slane %v48_v14, 1  ;;  %v86_v33 = vrot.slane %v85_v15, 2 }
  0x1a   :  { %143 = vmatpush.msra.mxu0 %v93_v10  ;;  %v36_v34 = vadd.f32 %v35_v16, %v34_v6  ;;  %196 = vmatpush.msra.mxu2 %v93_v10  ;;  %v74_v40 = vrot.slane %v73_v20, 1  ;;  %vm126_vm1 = vcmask 1041409   ;;  %v68_v42 = vmax.f32 %v66_v7, %v67_v17 }
  0x1b   :  { %163 = vmatpush.msra.mxu1 %v109_v11  ;;  %216 = vmatpush.msra.mxu3 %v109_v11  ;;  %v58_v37 = vmul.f32 %v584_v48, %v29_v26  ;;  %v60_v38 = vmul.f32 %v584_v48, %v43_v31  ;;  %v50_v39 = vadd.f32 %v49_v32, %v48_v14  ;;  %vm225_vm2 = vcmask 130048  }
  0x1c   :  { %144 = vmatpush.msra.mxu0 %v92_v24  ;;  %v59_v41 = vmul.f32 %v584_v48, %v36_v34  ;;  %v82_v43 = vmax.f32 %v80_v8, %v81_v18  ;;  %197 = vmatpush.msra.mxu2 %v92_v24  ;;  %v87_v47 = vmax.f32 %v85_v15, %v86_v33  ;;  %vm353_vm10 = vcmask 1040384  }
  0x1d   :  { %164 = vmatpush.msra.mxu1 %v108_v25  ;;  %217 = vmatpush.msra.mxu3 %v108_v25  ;;  %v61_v46 = vmul.f32 %v584_v48, %v50_v39  ;;  %v127_v49 = vsel %vm126_vm1, %v60_v38, %v58_v37  ;;  %v75_v51 = vmax.f32 %v73_v20, %v74_v40 }
  0x1e   :  { %145 = vmatpush.msra.mxu0 %v91_v35  ;;  %198 = vmatpush.msra.mxu2 %v91_v35  ;;  %v88_v52 = vrot.slane %v87_v47, 1  ;;  %v180_v53 = vsel %vm126_vm1, %v82_v43, %v68_v42 }
  0x1f   :  { %165 = vmatpush.msra.mxu1 %v107_v36  ;;  %218 = vmatpush.msra.mxu3 %v107_v36  ;;  %v128_v50 = vsel %vm126_vm1, %v61_v46, %v59_v41 }
  0x20   :  { %146 = vmatpush.msra.mxu0 %v90_v44  ;;  %199 = vmatpush.msra.mxu2 %v90_v44  ;;  %v89_v48 = vmax.f32 %v87_v47, %v88_v52 }
  0x21   :  { %166 = vmatpush.msra.mxu1 %v106_v45  ;;  %219 = vmatpush.msra.mxu3 %v106_v45 }
  0x22   :  { %147 = vmatmul.f32.vlgmr.msra.gmra.mxu0 %v127_v49  ;;  %167 = vmatmul.f32.vlgmr.msra.gmra.mxu1 %v128_v50  ;;  %v181_v56 = vsel %vm126_vm1, %v89_v48, %v75_v51 }
  0x23   :  { %200 = vmatmul.f32.vlgmr.msra.gmra.mxu2 %v180_v53  ;;  %306 = vmatpush.msrb.mxu3 %v175_v54 }
  0x24   :  { %220 = vmatmul.f32.vlgmr.msra.gmra.mxu3 %v181_v56  ;;  %286 = vmatpush.msrb.mxu2 %v174_v55 }
  0x25   :  { %263 = vmatpush.msrb.mxu1 %v175_v54  ;;  %243 = vmatpush.msrb.mxu0 %v174_v55 }
  0x26   :  { %307 = vmatpush.msrb.mxu3 %v173_v57  ;;  %287 = vmatpush.msrb.mxu2 %v172_v58 }
  0x27   :  { %264 = vmatpush.msrb.mxu1 %v173_v57  ;;  %244 = vmatpush.msrb.mxu0 %v172_v58 }
  0x9f   :  { %v148_v59 = vpop.f32.mrf.mxu0  ;;  %v168_v60 = vpop.f32.mrf.mxu1 }
  0xa0   :  { %v169_v61 = vadd.f32 %v168_v60, %v148_v59 }
  0xa2   :  { %v171_v62 = vmax.f32 %v169_v61, 0.0 }
  0xa4   :  { %401 = vmatmul.msk.f32.vlgmr.msrb.gmra.mxu2 %vm225_vm2, %v171_v62  ;;  %402 = vmatmul.msk.f32.vlgmr.msrb.gmra.mxu3 %vm225_vm2, %v171_v62 }
  0xa6   :  { %v201_v63 = vpop.f32.mrf.mxu2 }
  0xa7   :  { %v221_v0 = vpop.f32.mrf.mxu3 }
  0xa8   :  { %v222_v1 = vadd.f32 %v221_v0, %v201_v63 }
  0xaa   :  { %v224_v2 = vmax.f32 %v222_v1, 0.0 }
  0xac   :  { %399 = vmatmul.msk.f32.vlgmr.msrb.gmra.mxu0 %vm225_vm2, %v224_v2  ;;  %400 = vmatmul.msk.f32.vlgmr.msrb.gmra.mxu1 %vm225_vm2, %v224_v2 }
 0x127   :  { %v289_v3 = vpop.f32.mrf.mxu2  ;;  %v309_v4 = vpop.f32.mrf.mxu3 }
 0x129   :  { %v246_v5 = vpop.f32.mrf.mxu0  ;;  %v266_v6 = vpop.f32.mrf.mxu1 }
 0x12a   :  { %v290_v7 = vadd.f32 %v289_v3, %v246_v5  ;;  %v310_v8 = vadd.f32 %v309_v4, %v266_v6 }
 0x12c   :  { %v403_v9 = vmul.f32 -1.442695, %v290_v7  ;;  %v404_v10 = vmul.f32 -1.442695, %v310_v8 }
 0x12e   :  { %411 = vpow2.f32 %v403_v9 }
 0x12f   :  { %413 = vpow2.f32 %v404_v10 }
 0x134   :  { %v412_v11 = vpop.eup %411 }
 0x135   :  { %v414_v12 = vpop.eup %413  ;;  %v318_v13 = vadd.f32 1.0, %v412_v11 }
 0x136   :  { %v319_v14 = vadd.f32 1.0, %v414_v12 }
 0x137   :  { %415 = vrcp.f32 %v318_v13  ;;  %vm325_vm5 = vweird.f32 %v318_v13  ;;  %v331_v34 = vand.u32 2147483648, %v318_v13  ;;  %v329_v35 = vand.u32 2147483647, %v318_v13 }
 0x138   :  { %417 = vrcp.f32 %v319_v14  ;;  %v346_v26 = vand.u32 2147483648, %v319_v14  ;;  %v344_v32 = vand.u32 2147483647, %v319_v14  ;;  %vm340_vm7 = vweird.f32 %v319_v14 }
 0x139   :  { %v332_v40 = vor.u32 1.1754944e-38, %v331_v34  ;;  %vm330_vm11 = vcmp.eq.f32.partialorder %v329_v35, 8.507059e+37 }
 0x13a   :  { %v347_v37 = vor.u32 1.1754944e-38, %v346_v26  ;;  %vm345_vm9 = vcmp.eq.f32.partialorder %v344_v32, 8.507059e+37 }
 0x13d   :  { %v416_v15 = vpop.eup %415 }
 0x13e   :  { %v418_v16 = vpop.eup %417  ;;  %v321_v17 = vmul.f32 %v416_v15, %v318_v13  ;;  %vm326_vm3 = vweird.f32 %v416_v15 }
 0x13f   :  { %v336_v18 = vmul.f32 %v418_v16, %v319_v14  ;;  %vm341_vm4 = vweird.f32 %v418_v16  ;;  %vm327_vm6 = vmor %vm325_vm5, %vm326_vm3 }
 0x140   :  { %v322_v20 = vsub.f32 1.0, %v321_v17  ;;  %vm342_vm8 = vmor %vm340_vm7, %vm341_vm4 }
 0x141   :  { %v337_v24 = vsub.f32 1.0, %v336_v18 }
 0x142   :  { %v323_v25 = vmul.f32 %v416_v15, %v322_v20 }
 0x143   :  { %v338_v31 = vmul.f32 %v418_v16, %v337_v24 }
 0x144   :  { %v324_v33 = vadd.f32 %v416_v15, %v323_v25 }
 0x145   :  { %v339_v36 = vadd.f32 %v418_v16, %v338_v31 }
 0x146   :  { %v328_v38 = vsel %vm327_vm6, %v416_v15, %v324_v33 }
 0x147   :  { %v343_v39 = vsel %vm342_vm8, %v418_v16, %v339_v36  ;;  %v333_v43 = vsel %vm330_vm11, %v332_v40, %v328_v38 }
 0x148   :  { %v348_v41 = vsel %vm345_vm9, %v347_v37, %v343_v39 }
 0x149   :  { %v352_v42 = vrot.slane %v348_v41, 7 }
 0x14b   :  { %v354_v44 = vsel %vm353_vm10, %v333_v43, %v352_v42  ;;  %v355_v45 = vsel %vm126_vm1, %v333_v43, %v352_v42 }
 0x14c   :  { %v356_v46 = vrot.slane %v355_v45, 1  ;;  %v357_v47 = vperm.slane %v354_v44, 0  ;;  %v358_v49 = vperm.slane %v354_v44, 1 }
 0x14e   :  { %v359_v50 = vperm.slane %v356_v46, 0  ;;  %v360_v51 = vperm.slane %v356_v46, 1  ;;  %v365_v52 = vmul.f32 %v357_v47, %v520_v19  ;;  %v366_v53 = vmul.f32 %v358_v49, %v544_v27 }
 0x14f   :  { %v367_v54 = vmul.f32 %v357_v47, %v525_v21  ;;  %v368_v48 = vmul.f32 %v358_v49, %v549_v28 }
 0x150   :  { %v369_v55 = vmul.f32 %v359_v50, %v530_v22  ;;  %373 = vst [vmem:[#allocation2] sm:$0xff] %v365_v52  ;;  %v370_v56 = vmul.f32 %v360_v51, %v554_v29  ;;  %v371_v19 = vmul.f32 %v359_v50, %v535_v23  ;;  %v372_v27 = vmul.f32 %v360_v51, %v559_v30 }
 0x151   :  { %374 = vst [vmem:[#allocation2 + $0x8] sm:$0xff] %v366_v53 }
 0x152   :  { %375 = vst [vmem:[#allocation2 + $0x10] sm:$0xff] %v367_v54 }
 0x153   :  { %376 = vst [vmem:[#allocation2 + $0x18] sm:$0xff] %v368_v48 }
 0x154   :  { %377 = vst [vmem:[#allocation2 + $0x20] sm:$0xff] %v369_v55 }
 0x155   :  { %378 = vst [vmem:[#allocation2 + $0x28] sm:$0xff] %v370_v56 }
 0x156   :  { %379 = vst [vmem:[#allocation2 + $0x30] sm:$0xff] %v371_v19 }
 0x157   :  { %380 = vst [vmem:[#allocation2 + $0x38] sm:$0xff] %v372_v27 }
 0x158   :  { %393 = dma.vmem_to_hbm [thread:$0]  %s386_s16, 1024, %s388_s19, [#allocation3], %s447_s20, %s447_s20, %s448_s21  }
 0x159   :  { %443 = dma.done.wait [#allocation3], 1024  }
 0x15a   :  { %444 = vsyncadd [#allocation3], 4294966272 }
 0x15b   :  { %398 = vsyncpa [#allocation3], 1 }

</bundles_post_ra>
